<compile_context>
chip_gen: v7x
topology: tpu7x:2x2x1
jax: 0.10.0
libtpu: 0.0.40
codegen_flags: <defaults>
</compile_context>

<pallas_src>
import functools

import jax
import jax.numpy as jnp
from jax.experimental import pallas as pl
from jax.experimental.pallas import tpu as pltpu


def _im2col_store(act, C, H, W, col_ref, not_left, not_right):
    """Write the 3x3 im2col slab of `act` into col_ref.

    act      : (C, H*W) f32, channels on sublanes, flattened spatial on lanes.
    col_ref  : (9*C, H*W) f32 VMEM scratch; row t*C + c = tap t of channel c,
               t = dy*3 + dx.
    Padding trick: a flat buffer of length (H+2)*W + 2 with W+1 zero guards at
    each end makes every tap a contiguous lane window at offset dy*W + dx; the
    only correction needed is zeroing the column-wrapping lanes for dx==0/dx==2.
    """
    HW = H * W
    F = W + 1
    zeros = jnp.zeros((C, F), act.dtype)
    pad = jnp.concatenate([zeros, act, zeros], axis=1)  # (C, (H+2)*W + 2)
    for dy in range(3):
        for dx in range(3):
            t = dy * 3 + dx
            off = dy * W + dx
            patch = pad[:, off:off + HW]
            if dx == 0:
                patch = jnp.where(not_left, patch, 0.0)
            elif dx == 2:
                patch = jnp.where(not_right, patch, 0.0)
            col_ref[pl.ds(t * C, C), :] = patch


def basic_block_kernel(x_ref, w1_ref, s1_ref, b1_ref, w2_ref, s2_ref, b2_ref,
                       o_ref, col1_ref, col2_ref, *, H, W):
    # x_ref : (1, Cin,  H*W) f32      o_ref : (1, Cout, H*W) f32
    # w1_ref: (Cout, 9*Cin) bf16      w2_ref: (Cout, 9*Cout) bf16
    # s*/b* : (Cout, 1) f32           col*  : (9*C, H*W) f32 VMEM scratch
    HW = H * W
    Cin = x_ref.shape[1]
    Cout = o_ref.shape[1]

    # Edge masks for the column-wrapping taps, hoisted (shared by both convs).
    col_ids = jax.lax.broadcasted_iota(jnp.int32, (1, HW), 1) % W
    not_left = col_ids != 0
    not_right = col_ids != (W - 1)

    x = x_ref[0]  # (Cin, HW) f32 — kept for the residual add.

    # conv1 (single 9*Cin-deep bf16 contraction) + bn1 + relu; h stays in VMEM.
    _im2col_store(x, Cin, H, W, col1_ref, not_left, not_right)
    h = jnp.dot(w1_ref[...], col1_ref[...].astype(jnp.bfloat16),
                preferred_element_type=jnp.float32)          # (Cout, HW) f32
    h = jnp.maximum(h * s1_ref[...] + b1_ref[...], 0.0)

    # conv2 + bn2 + residual + relu.
    _im2col_store(h, Cout, H, W, col2_ref, not_left, not_right)
    y = jnp.dot(w2_ref[...], col2_ref[...].astype(jnp.bfloat16),
                preferred_element_type=jnp.float32)          # (Cout, HW) f32
    y = y * s2_ref[...] + b2_ref[...]
    y = jnp.maximum(y + x, 0.0)
    o_ref[0] = y.astype(o_ref.dtype)                         # dense-lane store


def _fused_basic_block(x_flat, w1, s1, b1, w2, s2, b2, *, H, W):
    N, Cin, HW = x_flat.shape
    Cout = w1.shape[0]
    kern = functools.partial(basic_block_kernel, H=H, W=W)
    return pl.pallas_call(
        kern,
        out_shape=jax.ShapeDtypeStruct((N, Cout, HW), x_flat.dtype),
        grid_spec=pltpu.PrefetchScalarGridSpec(
            num_scalar_prefetch=0,
            grid=(N,),
            in_specs=[
                pl.BlockSpec((1, Cin, HW), lambda n: (n, 0, 0)),
                pl.BlockSpec((Cout, 9 * Cin), lambda n: (0, 0)),
                pl.BlockSpec((Cout, 1), lambda n: (0, 0)),
                pl.BlockSpec((Cout, 1), lambda n: (0, 0)),
                pl.BlockSpec((Cout, 9 * Cout), lambda n: (0, 0)),
                pl.BlockSpec((Cout, 1), lambda n: (0, 0)),
                pl.BlockSpec((Cout, 1), lambda n: (0, 0)),
            ],
            out_specs=pl.BlockSpec((1, Cout, HW), lambda n: (n, 0, 0)),
            scratch_shapes=[
                pltpu.VMEM((9 * Cin, HW), jnp.float32),   # im2col for conv1
                pltpu.VMEM((9 * Cout, HW), jnp.float32),  # im2col for conv2
            ],
        ),
        compiler_params=pltpu.CompilerParams(
            dimension_semantics=("parallel",),
            # 48 MiB: safe under v7x's 64 MiB/TC; raise toward 96 MiB on
            # v5e/v6e (128 MiB VMEM) if per-step tiles are enlarged.
            vmem_limit_bytes=48 * 1024 * 1024,
        ),
    )(x_flat, w1, s1, b1, w2, s2, b2)


def _fold_bn(gamma, beta, mean, var, eps=1e-5):
    scale = gamma / jnp.sqrt(var + eps)
    bias = beta - mean * scale
    return scale.reshape(-1, 1), bias.reshape(-1, 1)   # (C, 1) for sublane bcast


def _oihw_to_mat(w_oihw):
    # (Cout, Cin, 3, 3) -> (Cout, 3, 3, Cin) -> (Cout, 9*Cin); column index
    # (dy*3 + dx)*Cin + c matches the im2col row layout.
    cout, cin = w_oihw.shape[0], w_oihw.shape[1]
    return jnp.transpose(w_oihw, (0, 2, 3, 1)).reshape(cout, 9 * cin)


def init_basic_block_params(key, in_channels, out_channels):
    k1, k2, k3, k4, k5, k6 = jax.random.split(key, 6)
    p = {}
    p["conv1_w"] = 0.1 * jax.random.normal(
        k1, (out_channels, in_channels, 3, 3), jnp.float32)
    p["conv2_w"] = 0.1 * jax.random.normal(
        k2, (out_channels, out_channels, 3, 3), jnp.float32)
    p["bn1_gamma"] = 1.0 + 0.1 * jax.random.normal(k3, (out_channels,), jnp.float32)
    p["bn1_beta"] = 0.1 * jax.random.normal(k4, (out_channels,), jnp.float32)
    p["bn1_mean"] = jnp.zeros((out_channels,), jnp.float32)
    p["bn1_var"] = jnp.ones((out_channels,), jnp.float32)
    p["bn2_gamma"] = 1.0 + 0.1 * jax.random.normal(k5, (out_channels,), jnp.float32)
    p["bn2_beta"] = 0.1 * jax.random.normal(k6, (out_channels,), jnp.float32)
    p["bn2_mean"] = jnp.zeros((out_channels,), jnp.float32)
    p["bn2_var"] = jnp.ones((out_channels,), jnp.float32)
    return p


def basic_block_forward(x_nchw, params):
    # x_nchw: (N, C, H, W) like PyTorch; output in the same NCHW layout.
    N, C, H, W = x_nchw.shape
    Cout = params["conv1_w"].shape[0]
    assert Cout == C, "stride=1 / no-downsample BasicBlock requires Cin == Cout"
    # NCHW flattened is already channels-on-sublanes / spatial-on-lanes: no transposes.
    x_flat = x_nchw.reshape(N, C, H * W)
    w1 = _oihw_to_mat(params["conv1_w"]).astype(jnp.bfloat16)
    w2 = _oihw_to_mat(params["conv2_w"]).astype(jnp.bfloat16)
    s1, b1 = _fold_bn(params["bn1_gamma"], params["bn1_beta"],
                      params["bn1_mean"], params["bn1_var"])
    s2, b2 = _fold_bn(params["bn2_gamma"], params["bn2_beta"],
                      params["bn2_mean"], params["bn2_var"])
    y_flat = _fused_basic_block(x_flat, w1, s1, b1, w2, s2, b2, H=H, W=W)
    return y_flat.reshape(N, Cout, H, W)


def basic_block_reference(x_nchw, params, matmul_dtype=jnp.float32):
    """Pure-JAX reference (lax.conv). matmul_dtype=bf16 mirrors the kernel's
    bf16 matmul operands (f32 accumulation) for a tight structural check."""
    x = jnp.transpose(x_nchw, (0, 2, 3, 1))  # NHWC

    def conv(inp, w_oihw):
        w_hwio = jnp.transpose(w_oihw, (2, 3, 1, 0)).astype(matmul_dtype)
        return jax.lax.conv_general_dilated(
            inp.astype(matmul_dtype), w_hwio, window_strides=(1, 1),
            padding="SAME", dimension_numbers=("NHWC", "HWIO", "NHWC"),
            preferred_element_type=jnp.float32)

    def bn(inp, g, b, m, v, eps=1e-5):
        return (inp - m) / jnp.sqrt(v + eps) * g + b

    h = jax.nn.relu(bn(conv(x, params["conv1_w"]), params["bn1_gamma"],
                       params["bn1_beta"], params["bn1_mean"], params["bn1_var"]))
    y = bn(conv(h, params["conv2_w"]), params["bn2_gamma"],
           params["bn2_beta"], params["bn2_mean"], params["bn2_var"])
    y = jax.nn.relu(y + x)
    return jnp.transpose(y, (0, 3, 1, 2))


if __name__ == "__main__":
    N, C, H, W = 2, 4, 16, 16
    key = jax.random.PRNGKey(0)
    kx, kp = jax.random.split(key)
    x = jax.random.normal(kx, (N, C, H, W), jnp.float32)
    params = init_basic_block_params(kp, C, C)

    out = jax.block_until_ready(basic_block_forward(x, params))
    ref_bf16 = jax.block_until_ready(basic_block_reference(x, params, jnp.bfloat16))
    ref_f32 = jax.block_until_ready(basic_block_reference(x, params, jnp.float32))

    assert out.shape == (N, C, H, W)
    # Tight structural check against the same math with bf16 matmul operands.
    assert jnp.allclose(out, ref_bf16, atol=1e-2, rtol=1e-2), (
        float(jnp.max(jnp.abs(out - ref_bf16))))
    # Sanity check vs the full-f32 reference (slack bounds bf16 operand rounding).
    assert jnp.allclose(out, ref_f32, atol=1e-1, rtol=1e-1), (
        float(jnp.max(jnp.abs(out - ref_f32))))
    print("KERNEL_OK")
</pallas_src>

<mosaic_0001>
module attributes {stable_mosaic.version = 11 : i64} {
  func.func @basic_block_kernel(%arg0: i32, %arg1: memref<1x4x256xf32, #tpu.memory_space<vmem>>, %arg2: memref<4x36xbf16, #tpu.memory_space<vmem>>, %arg3: memref<4x1xf32, #tpu.memory_space<vmem>>, %arg4: memref<4x1xf32, #tpu.memory_space<vmem>>, %arg5: memref<4x36xbf16, #tpu.memory_space<vmem>>, %arg6: memref<4x1xf32, #tpu.memory_space<vmem>>, %arg7: memref<4x1xf32, #tpu.memory_space<vmem>>, %arg8: memref<1x4x256xf32, #tpu.memory_space<vmem>>, %arg9: memref<36x256xf32, #tpu.memory_space<vmem>>, %arg10: memref<36x256xf32, #tpu.memory_space<vmem>>) attributes {dimension_semantics = [#tpu.dimension_semantics<parallel>], iteration_bounds = array<i64: 2>, scalar_prefetch = 0 : i64, scratch_operands = 2 : i64, tpu.core_type = #tpu.core_type<tc>, window_params = [{transform_indices = @transform_0, window_bounds = array<i64: 1, 4, 256>}, {pipeline_mode = #tpu.pipeline_mode<synchronous>, transform_indices = @transform_1, window_bounds = array<i64: 4, 36>}, {pipeline_mode = #tpu.pipeline_mode<synchronous>, transform_indices = @transform_2, window_bounds = array<i64: 4, 1>}, {pipeline_mode = #tpu.pipeline_mode<synchronous>, transform_indices = @transform_3, window_bounds = array<i64: 4, 1>}, {pipeline_mode = #tpu.pipeline_mode<synchronous>, transform_indices = @transform_4, window_bounds = array<i64: 4, 36>}, {pipeline_mode = #tpu.pipeline_mode<synchronous>, transform_indices = @transform_5, window_bounds = array<i64: 4, 1>}, {pipeline_mode = #tpu.pipeline_mode<synchronous>, transform_indices = @transform_6, window_bounds = array<i64: 4, 1>}, {transform_indices = @transform_7, window_bounds = array<i64: 1, 4, 256>}]} {
    %0 = tpu.iota {dimensions = array<i32: 1>} : vector<1x256xi32>
    %c16_i32 = arith.constant 16 : i32
    %c0_i32 = arith.constant 0 : i32
    %1 = arith.cmpi eq, %c16_i32, %c0_i32 : i32
    %c1_i32 = arith.constant 1 : i32
    %2 = arith.select %1, %c1_i32, %c16_i32 : i32
    %3 = vector.broadcast %2 : i32 to vector<1x256xi32>
    %4 = arith.remsi %0, %3 : vector<1x256xi32>
    %c0_i32_0 = arith.constant 0 : i32
    %5 = vector.broadcast %c0_i32_0 : i32 to vector<1x256xi32>
    %6 = arith.cmpi ne, %4, %5 : vector<1x256xi32>
    %c0_i32_1 = arith.constant 0 : i32
    %7 = vector.broadcast %c0_i32_1 : i32 to vector<1x256xi32>
    %8 = arith.cmpi slt, %4, %7 : vector<1x256xi32>
    %c0_i32_2 = arith.constant 0 : i32
    %9 = arith.cmpi slt, %2, %c0_i32_2 : i32
    %10 = vector.broadcast %9 : i1 to vector<1x256xi1>
    %11 = vector.broadcast %10 : vector<1x256xi1> to vector<1x256xi1>
    %12 = arith.xori %8, %11 : vector<1x256xi1>
    %13 = arith.andi %12, %6 : vector<1x256xi1>
    %14 = vector.broadcast %2 : i32 to vector<1x256xi32>
    %15 = arith.addi %4, %14 : vector<1x256xi32>
    %16 = arith.select %13, %15, %4 : vector<1x256xi1>, vector<1x256xi32>
    %c0_i32_3 = arith.constant 0 : i32
    %17 = vector.broadcast %c0_i32_3 : i32 to vector<1x256xi32>
    %18 = arith.cmpi ne, %16, %17 : vector<1x256xi32>
    %c15_i32 = arith.constant 15 : i32
    %19 = vector.broadcast %c15_i32 : i32 to vector<1x256xi32>
    %20 = arith.cmpi ne, %16, %19 : vector<1x256xi32>
    %c0 = arith.constant 0 : index
    %c0_4 = arith.constant 0 : index
    %c0_5 = arith.constant 0 : index
    %21 = vector.load %arg1[%c0, %c0_4, %c0_5] : memref<1x4x256xf32, #tpu.memory_space<vmem>>, vector<1x4x256xf32>
    %22 = vector.shape_cast %21 : vector<1x4x256xf32> to vector<4x256xf32>
    %cst = arith.constant 0.000000e+00 : f32
    %23 = vector.broadcast %cst : f32 to vector<4x17xf32>
    %24 = tpu.concatenate %23, %22, %23 in 1 : vector<4x17xf32>, vector<4x256xf32>, vector<4x17xf32> -> vector<4x290xf32>
    %25 = vector.extract_strided_slice %24 {offsets = [0, 0], sizes = [4, 256], strides = [1, 1]} : vector<4x290xf32> to vector<4x256xf32>
    %cst_6 = arith.constant 0.000000e+00 : f32
    %26 = vector.shape_cast %18 : vector<1x256xi1> to vector<1x256xi1>
    %27 = vector.broadcast %26 : vector<1x256xi1> to vector<4x256xi1>
    %28 = vector.broadcast %cst_6 : f32 to vector<4x256xf32>
    %29 = arith.select %27, %25, %28 : vector<4x256xi1>, vector<4x256xf32>
    %c0_7 = arith.constant 0 : index
    %c0_8 = arith.constant 0 : index
    %30 = vector.load %arg9[%c0_7, %c0_8] : memref<36x256xf32, #tpu.memory_space<vmem>>, vector<4x256xf32>
    tpu.vector_store %arg9[%c0_7, %c0_8], %29 {strides = array<i32>} : memref<36x256xf32, #tpu.memory_space<vmem>>, vector<4x256xf32>,
    %31 = vector.extract_strided_slice %24 {offsets = [0, 1], sizes = [4, 256], strides = [1, 1]} : vector<4x290xf32> to vector<4x256xf32>
    %c4 = arith.constant 4 : index
    %c0_9 = arith.constant 0 : index
    %32 = vector.load %arg9[%c4, %c0_9] : memref<36x256xf32, #tpu.memory_space<vmem>>, vector<4x256xf32>
    tpu.vector_store %arg9[%c4, %c0_9], %31 {strides = array<i32>} : memref<36x256xf32, #tpu.memory_space<vmem>>, vector<4x256xf32>,
    %33 = vector.extract_strided_slice %24 {offsets = [0, 2], sizes = [4, 256], strides = [1, 1]} : vector<4x290xf32> to vector<4x256xf32>
    %cst_10 = arith.constant 0.000000e+00 : f32
    %34 = vector.shape_cast %20 : vector<1x256xi1> to vector<1x256xi1>
    %35 = vector.broadcast %34 : vector<1x256xi1> to vector<4x256xi1>
    %36 = vector.broadcast %cst_10 : f32 to vector<4x256xf32>
    %37 = arith.select %35, %33, %36 : vector<4x256xi1>, vector<4x256xf32>
    %c8 = arith.constant 8 : index
    %c0_11 = arith.constant 0 : index
    %38 = vector.load %arg9[%c8, %c0_11] : memref<36x256xf32, #tpu.memory_space<vmem>>, vector<4x256xf32>
    tpu.vector_store %arg9[%c8, %c0_11], %37 {strides = array<i32>} : memref<36x256xf32, #tpu.memory_space<vmem>>, vector<4x256xf32>,
    %39 = vector.extract_strided_slice %24 {offsets = [0, 16], sizes = [4, 256], strides = [1, 1]} : vector<4x290xf32> to vector<4x256xf32>
    %cst_12 = arith.constant 0.000000e+00 : f32
    %40 = vector.shape_cast %18 : vector<1x256xi1> to vector<1x256xi1>
    %41 = vector.broadcast %40 : vector<1x256xi1> to vector<4x256xi1>
    %42 = vector.broadcast %cst_12 : f32 to vector<4x256xf32>
    %43 = arith.select %41, %39, %42 : vector<4x256xi1>, vector<4x256xf32>
    %c12 = arith.constant 12 : index
    %c0_13 = arith.constant 0 : index
    %44 = vector.load %arg9[%c12, %c0_13] : memref<36x256xf32, #tpu.memory_space<vmem>>, vector<4x256xf32>
    tpu.vector_store %arg9[%c12, %c0_13], %43 {strides = array<i32>} : memref<36x256xf32, #tpu.memory_space<vmem>>, vector<4x256xf32>,
    %45 = vector.extract_strided_slice %24 {offsets = [0, 17], sizes = [4, 256], strides = [1, 1]} : vector<4x290xf32> to vector<4x256xf32>
    %c16 = arith.constant 16 : index
    %c0_14 = arith.constant 0 : index
    %46 = vector.load %arg9[%c16, %c0_14] : memref<36x256xf32, #tpu.memory_space<vmem>>, vector<4x256xf32>
    tpu.vector_store %arg9[%c16, %c0_14], %45 {strides = array<i32>} : memref<36x256xf32, #tpu.memory_space<vmem>>, vector<4x256xf32>,
    %47 = vector.extract_strided_slice %24 {offsets = [0, 18], sizes = [4, 256], strides = [1, 1]} : vector<4x290xf32> to vector<4x256xf32>
    %cst_15 = arith.constant 0.000000e+00 : f32
    %48 = vector.shape_cast %20 : vector<1x256xi1> to vector<1x256xi1>
    %49 = vector.broadcast %48 : vector<1x256xi1> to vector<4x256xi1>
    %50 = vector.broadcast %cst_15 : f32 to vector<4x256xf32>
    %51 = arith.select %49, %47, %50 : vector<4x256xi1>, vector<4x256xf32>
    %c20 = arith.constant 20 : index
    %c0_16 = arith.constant 0 : index
    %52 = vector.load %arg9[%c20, %c0_16] : memref<36x256xf32, #tpu.memory_space<vmem>>, vector<4x256xf32>
    tpu.vector_store %arg9[%c20, %c0_16], %51 {strides = array<i32>} : memref<36x256xf32, #tpu.memory_space<vmem>>, vector<4x256xf32>,
    %53 = vector.extract_strided_slice %24 {offsets = [0, 32], sizes = [4, 256], strides = [1, 1]} : vector<4x290xf32> to vector<4x256xf32>
    %cst_17 = arith.constant 0.000000e+00 : f32
    %54 = vector.shape_cast %18 : vector<1x256xi1> to vector<1x256xi1>
    %55 = vector.broadcast %54 : vector<1x256xi1> to vector<4x256xi1>
    %56 = vector.broadcast %cst_17 : f32 to vector<4x256xf32>
    %57 = arith.select %55, %53, %56 : vector<4x256xi1>, vector<4x256xf32>
    %c24 = arith.constant 24 : index
    %c0_18 = arith.constant 0 : index
    %58 = vector.load %arg9[%c24, %c0_18] : memref<36x256xf32, #tpu.memory_space<vmem>>, vector<4x256xf32>
    tpu.vector_store %arg9[%c24, %c0_18], %57 {strides = array<i32>} : memref<36x256xf32, #tpu.memory_space<vmem>>, vector<4x256xf32>,
    %59 = vector.extract_strided_slice %24 {offsets = [0, 33], sizes = [4, 256], strides = [1, 1]} : vector<4x290xf32> to vector<4x256xf32>
    %c28 = arith.constant 28 : index
    %c0_19 = arith.constant 0 : index
    %60 = vector.load %arg9[%c28, %c0_19] : memref<36x256xf32, #tpu.memory_space<vmem>>, vector<4x256xf32>
    tpu.vector_store %arg9[%c28, %c0_19], %59 {strides = array<i32>} : memref<36x256xf32, #tpu.memory_space<vmem>>, vector<4x256xf32>,
    %61 = vector.extract_strided_slice %24 {offsets = [0, 34], sizes = [4, 256], strides = [1, 1]} : vector<4x290xf32> to vector<4x256xf32>
    %cst_20 = arith.constant 0.000000e+00 : f32
    %62 = vector.shape_cast %20 : vector<1x256xi1> to vector<1x256xi1>
    %63 = vector.broadcast %62 : vector<1x256xi1> to vector<4x256xi1>
    %64 = vector.broadcast %cst_20 : f32 to vector<4x256xf32>
    %65 = arith.select %63, %61, %64 : vector<4x256xi1>, vector<4x256xf32>
    %c32 = arith.constant 32 : index
    %c0_21 = arith.constant 0 : index
    %66 = vector.load %arg9[%c32, %c0_21] : memref<36x256xf32, #tpu.memory_space<vmem>>, vector<4x256xf32>
    tpu.vector_store %arg9[%c32, %c0_21], %65 {strides = array<i32>} : memref<36x256xf32, #tpu.memory_space<vmem>>, vector<4x256xf32>,
    %c0_22 = arith.constant 0 : index
    %c0_23 = arith.constant 0 : index
    %67 = vector.load %arg2[%c0_22, %c0_23] : memref<4x36xbf16, #tpu.memory_space<vmem>>, vector<4x36xbf16>
    %c0_24 = arith.constant 0 : index
    %c0_25 = arith.constant 0 : index
    %68 = vector.load %arg9[%c0_24, %c0_25] : memref<36x256xf32, #tpu.memory_space<vmem>>, vector<36x256xf32>
    %69 = arith.truncf %68 : vector<36x256xf32> to vector<36x256xbf16>
    %cst_26 = arith.constant dense<0.000000e+00> : vector<4x256xf32>
    %70 = tpu.matmul %67, %69, %cst_26 {dimension_numbers = #tpu.dot_dimension_numbers<[1], [0], [0], [1], [0, 0, 1, 1], [], []>} : vector<4x36xbf16>, vector<36x256xbf16>, vector<4x256xf32> -> vector<4x256xf32>
    %c0_27 = arith.constant 0 : index
    %c0_28 = arith.constant 0 : index
    %71 = vector.load %arg3[%c0_27, %c0_28] : memref<4x1xf32, #tpu.memory_space<vmem>>, vector<4x1xf32>
    %72 = vector.broadcast %71 : vector<4x1xf32> to vector<4x256xf32>
    %73 = arith.mulf %70, %72 : vector<4x256xf32>
    %c0_29 = arith.constant 0 : index
    %c0_30 = arith.constant 0 : index
    %74 = vector.load %arg4[%c0_29, %c0_30] : memref<4x1xf32, #tpu.memory_space<vmem>>, vector<4x1xf32>
    %75 = vector.broadcast %74 : vector<4x1xf32> to vector<4x256xf32>
    %76 = arith.addf %73, %75 : vector<4x256xf32>
    %cst_31 = arith.constant 0.000000e+00 : f32
    %77 = vector.broadcast %cst_31 : f32 to vector<4x256xf32>
    %78 = arith.maximumf %76, %77 : vector<4x256xf32>
    %cst_32 = arith.constant 0.000000e+00 : f32
    %79 = vector.broadcast %cst_32 : f32 to vector<4x17xf32>
    %80 = tpu.concatenate %79, %78, %79 in 1 : vector<4x17xf32>, vector<4x256xf32>, vector<4x17xf32> -> vector<4x290xf32>
    %81 = vector.extract_strided_slice %80 {offsets = [0, 0], sizes = [4, 256], strides = [1, 1]} : vector<4x290xf32> to vector<4x256xf32>
    %cst_33 = arith.constant 0.000000e+00 : f32
    %82 = vector.shape_cast %18 : vector<1x256xi1> to vector<1x256xi1>
    %83 = vector.broadcast %82 : vector<1x256xi1> to vector<4x256xi1>
    %84 = vector.broadcast %cst_33 : f32 to vector<4x256xf32>
    %85 = arith.select %83, %81, %84 : vector<4x256xi1>, vector<4x256xf32>
    %c0_34 = arith.constant 0 : index
    %c0_35 = arith.constant 0 : index
    %86 = vector.load %arg10[%c0_34, %c0_35] : memref<36x256xf32, #tpu.memory_space<vmem>>, vector<4x256xf32>
    tpu.vector_store %arg10[%c0_34, %c0_35], %85 {strides = array<i32>} : memref<36x256xf32, #tpu.memory_space<vmem>>, vector<4x256xf32>,
    %87 = vector.extract_strided_slice %80 {offsets = [0, 1], sizes = [4, 256], strides = [1, 1]} : vector<4x290xf32> to vector<4x256xf32>
    %c4_36 = arith.constant 4 : index
    %c0_37 = arith.constant 0 : index
    %88 = vector.load %arg10[%c4_36, %c0_37] : memref<36x256xf32, #tpu.memory_space<vmem>>, vector<4x256xf32>
    tpu.vector_store %arg10[%c4_36, %c0_37], %87 {strides = array<i32>} : memref<36x256xf32, #tpu.memory_space<vmem>>, vector<4x256xf32>,
    %89 = vector.extract_strided_slice %80 {offsets = [0, 2], sizes = [4, 256], strides = [1, 1]} : vector<4x290xf32> to vector<4x256xf32>
    %cst_38 = arith.constant 0.000000e+00 : f32
    %90 = vector.shape_cast %20 : vector<1x256xi1> to vector<1x256xi1>
    %91 = vector.broadcast %90 : vector<1x256xi1> to vector<4x256xi1>
    %92 = vector.broadcast %cst_38 : f32 to vector<4x256xf32>
    %93 = arith.select %91, %89, %92 : vector<4x256xi1>, vector<4x256xf32>
    %c8_39 = arith.constant 8 : index
    %c0_40 = arith.constant 0 : index
    %94 = vector.load %arg10[%c8_39, %c0_40] : memref<36x256xf32, #tpu.memory_space<vmem>>, vector<4x256xf32>
    tpu.vector_store %arg10[%c8_39, %c0_40], %93 {strides = array<i32>} : memref<36x256xf32, #tpu.memory_space<vmem>>, vector<4x256xf32>,
    %95 = vector.extract_strided_slice %80 {offsets = [0, 16], sizes = [4, 256], strides = [1, 1]} : vector<4x290xf32> to vector<4x256xf32>
    %cst_41 = arith.constant 0.000000e+00 : f32
    %96 = vector.shape_cast %18 : vector<1x256xi1> to vector<1x256xi1>
    %97 = vector.broadcast %96 : vector<1x256xi1> to vector<4x256xi1>
    %98 = vector.broadcast %cst_41 : f32 to vector<4x256xf32>
    %99 = arith.select %97, %95, %98 : vector<4x256xi1>, vector<4x256xf32>
    %c12_42 = arith.constant 12 : index
    %c0_43 = arith.constant 0 : index
    %100 = vector.load %arg10[%c12_42, %c0_43] : memref<36x256xf32, #tpu.memory_space<vmem>>, vector<4x256xf32>
    tpu.vector_store %arg10[%c12_42, %c0_43], %99 {strides = array<i32>} : memref<36x256xf32, #tpu.memory_space<vmem>>, vector<4x256xf32>,
    %101 = vector.extract_strided_slice %80 {offsets = [0, 17], sizes = [4, 256], strides = [1, 1]} : vector<4x290xf32> to vector<4x256xf32>
    %c16_44 = arith.constant 16 : index
    %c0_45 = arith.constant 0 : index
    %102 = vector.load %arg10[%c16_44, %c0_45] : memref<36x256xf32, #tpu.memory_space<vmem>>, vector<4x256xf32>
    tpu.vector_store %arg10[%c16_44, %c0_45], %101 {strides = array<i32>} : memref<36x256xf32, #tpu.memory_space<vmem>>, vector<4x256xf32>,
    %103 = vector.extract_strided_slice %80 {offsets = [0, 18], sizes = [4, 256], strides = [1, 1]} : vector<4x290xf32> to vector<4x256xf32>
    %cst_46 = arith.constant 0.000000e+00 : f32
    %104 = vector.shape_cast %20 : vector<1x256xi1> to vector<1x256xi1>
    %105 = vector.broadcast %104 : vector<1x256xi1> to vector<4x256xi1>
    %106 = vector.broadcast %cst_46 : f32 to vector<4x256xf32>
    %107 = arith.select %105, %103, %106 : vector<4x256xi1>, vector<4x256xf32>
    %c20_47 = arith.constant 20 : index
    %c0_48 = arith.constant 0 : index
    %108 = vector.load %arg10[%c20_47, %c0_48] : memref<36x256xf32, #tpu.memory_space<vmem>>, vector<4x256xf32>
    tpu.vector_store %arg10[%c20_47, %c0_48], %107 {strides = array<i32>} : memref<36x256xf32, #tpu.memory_space<vmem>>, vector<4x256xf32>,
    %109 = vector.extract_strided_slice %80 {offsets = [0, 32], sizes = [4, 256], strides = [1, 1]} : vector<4x290xf32> to vector<4x256xf32>
    %cst_49 = arith.constant 0.000000e+00 : f32
    %110 = vector.shape_cast %18 : vector<1x256xi1> to vector<1x256xi1>
    %111 = vector.broadcast %110 : vector<1x256xi1> to vector<4x256xi1>
    %112 = vector.broadcast %cst_49 : f32 to vector<4x256xf32>
    %113 = arith.select %111, %109, %112 : vector<4x256xi1>, vector<4x256xf32>
    %c24_50 = arith.constant 24 : index
    %c0_51 = arith.constant 0 : index
    %114 = vector.load %arg10[%c24_50, %c0_51] : memref<36x256xf32, #tpu.memory_space<vmem>>, vector<4x256xf32>
    tpu.vector_store %arg10[%c24_50, %c0_51], %113 {strides = array<i32>} : memref<36x256xf32, #tpu.memory_space<vmem>>, vector<4x256xf32>,
    %115 = vector.extract_strided_slice %80 {offsets = [0, 33], sizes = [4, 256], strides = [1, 1]} : vector<4x290xf32> to vector<4x256xf32>
    %c28_52 = arith.constant 28 : index
    %c0_53 = arith.constant 0 : index
    %116 = vector.load %arg10[%c28_52, %c0_53] : memref<36x256xf32, #tpu.memory_space<vmem>>, vector<4x256xf32>
    tpu.vector_store %arg10[%c28_52, %c0_53], %115 {strides = array<i32>} : memref<36x256xf32, #tpu.memory_space<vmem>>, vector<4x256xf32>,
    %117 = vector.extract_strided_slice %80 {offsets = [0, 34], sizes = [4, 256], strides = [1, 1]} : vector<4x290xf32> to vector<4x256xf32>
    %cst_54 = arith.constant 0.000000e+00 : f32
    %118 = vector.shape_cast %20 : vector<1x256xi1> to vector<1x256xi1>
    %119 = vector.broadcast %118 : vector<1x256xi1> to vector<4x256xi1>
    %120 = vector.broadcast %cst_54 : f32 to vector<4x256xf32>
    %121 = arith.select %119, %117, %120 : vector<4x256xi1>, vector<4x256xf32>
    %c32_55 = arith.constant 32 : index
    %c0_56 = arith.constant 0 : index
    %122 = vector.load %arg10[%c32_55, %c0_56] : memref<36x256xf32, #tpu.memory_space<vmem>>, vector<4x256xf32>
    tpu.vector_store %arg10[%c32_55, %c0_56], %121 {strides = array<i32>} : memref<36x256xf32, #tpu.memory_space<vmem>>, vector<4x256xf32>,
    %c0_57 = arith.constant 0 : index
    %c0_58 = arith.constant 0 : index
    %123 = vector.load %arg5[%c0_57, %c0_58] : memref<4x36xbf16, #tpu.memory_space<vmem>>, vector<4x36xbf16>
    %c0_59 = arith.constant 0 : index
    %c0_60 = arith.constant 0 : index
    %124 = vector.load %arg10[%c0_59, %c0_60] : memref<36x256xf32, #tpu.memory_space<vmem>>, vector<36x256xf32>
    %125 = arith.truncf %124 : vector<36x256xf32> to vector<36x256xbf16>
    %cst_61 = arith.constant dense<0.000000e+00> : vector<4x256xf32>
    %126 = tpu.matmul %123, %125, %cst_61 {dimension_numbers = #tpu.dot_dimension_numbers<[1], [0], [0], [1], [0, 0, 1, 1], [], []>} : vector<4x36xbf16>, vector<36x256xbf16>, vector<4x256xf32> -> vector<4x256xf32>
    %c0_62 = arith.constant 0 : index
    %c0_63 = arith.constant 0 : index
    %127 = vector.load %arg6[%c0_62, %c0_63] : memref<4x1xf32, #tpu.memory_space<vmem>>, vector<4x1xf32>
    %128 = vector.broadcast %127 : vector<4x1xf32> to vector<4x256xf32>
    %129 = arith.mulf %126, %128 : vector<4x256xf32>
    %c0_64 = arith.constant 0 : index
    %c0_65 = arith.constant 0 : index
    %130 = vector.load %arg7[%c0_64, %c0_65] : memref<4x1xf32, #tpu.memory_space<vmem>>, vector<4x1xf32>
    %131 = vector.broadcast %130 : vector<4x1xf32> to vector<4x256xf32>
    %132 = arith.addf %129, %131 : vector<4x256xf32>
    %133 = arith.addf %132, %22 : vector<4x256xf32>
    %cst_66 = arith.constant 0.000000e+00 : f32
    %134 = vector.broadcast %cst_66 : f32 to vector<4x256xf32>
    %135 = arith.maximumf %133, %134 : vector<4x256xf32>
    %c0_67 = arith.constant 0 : index
    %c0_68 = arith.constant 0 : index
    %c0_69 = arith.constant 0 : index
    %136 = vector.load %arg8[%c0_67, %c0_68, %c0_69] : memref<1x4x256xf32, #tpu.memory_space<vmem>>, vector<1x4x256xf32>
    %137 = vector.shape_cast %136 : vector<1x4x256xf32> to vector<4x256xf32>
    %138 = vector.shape_cast %135 : vector<4x256xf32> to vector<1x4x256xf32>
    tpu.vector_store %arg8[%c0_67, %c0_68, %c0_69], %138 {strides = array<i32>} : memref<1x4x256xf32, #tpu.memory_space<vmem>>, vector<1x4x256xf32>,
    return
  }
  func.func @transform_0(%arg0: i32) -> (i32, i32, i32) {
    %c0_i32 = arith.constant 0 : i32
    %c0_i32_0 = arith.constant 0 : i32
    %c0_i32_1 = arith.constant 0 : i32
    return %arg0, %c0_i32, %c0_i32_0 : i32, i32, i32
  }
  func.func @transform_1(%arg0: i32) -> (i32, i32) {
    %c0_i32 = arith.constant 0 : i32
    %c0_i32_0 = arith.constant 0 : i32
    %c0_i32_1 = arith.constant 0 : i32
    return %c0_i32, %c0_i32_0 : i32, i32
  }
  func.func @transform_2(%arg0: i32) -> (i32, i32) {
    %c0_i32 = arith.constant 0 : i32
    %c0_i32_0 = arith.constant 0 : i32
    %c0_i32_1 = arith.constant 0 : i32
    return %c0_i32, %c0_i32_0 : i32, i32
  }
  func.func @transform_3(%arg0: i32) -> (i32, i32) {
    %c0_i32 = arith.constant 0 : i32
    %c0_i32_0 = arith.constant 0 : i32
    %c0_i32_1 = arith.constant 0 : i32
    return %c0_i32, %c0_i32_0 : i32, i32
  }
  func.func @transform_4(%arg0: i32) -> (i32, i32) {
    %c0_i32 = arith.constant 0 : i32
    %c0_i32_0 = arith.constant 0 : i32
    %c0_i32_1 = arith.constant 0 : i32
    return %c0_i32, %c0_i32_0 : i32, i32
  }
  func.func @transform_5(%arg0: i32) -> (i32, i32) {
    %c0_i32 = arith.constant 0 : i32
    %c0_i32_0 = arith.constant 0 : i32
    %c0_i32_1 = arith.constant 0 : i32
    return %c0_i32, %c0_i32_0 : i32, i32
  }
  func.func @transform_6(%arg0: i32) -> (i32, i32) {
    %c0_i32 = arith.constant 0 : i32
    %c0_i32_0 = arith.constant 0 : i32
    %c0_i32_1 = arith.constant 0 : i32
    return %c0_i32, %c0_i32_0 : i32, i32
  }
  func.func @transform_7(%arg0: i32) -> (i32, i32, i32) {
    %c0_i32 = arith.constant 0 : i32
    %c0_i32_0 = arith.constant 0 : i32
    %c0_i32_1 = arith.constant 0 : i32
    return %arg0, %c0_i32, %c0_i32_0 : i32, i32, i32
  }
}

</mosaic_0001>

<bundles_post_ra>
// kernel: tpu_custom_call.1
= control target key start
LH: loop header
LB: loop body
LE: loop exit
PB: predicated region body
PF: predicated region fallthrough
CT: control target
= control target key end

     0   :  { %12 = vsyncpa [#allocation5], 0  ;;  %s1347_s0 = inlined_call_operand.vmem [shape: f32[2,4,256], index: 0, kind: input, shape index: {}]   ;;  %s1348_s1 = inlined_call_operand.vmem [shape: bf16[4,36], index: 1, kind: input, shape index: {}]   ;;  %s1349_s2 = inlined_call_operand.vmem [shape: f32[4,1], index: 2, kind: input, shape index: {}]   ;;  %s1350_s3 = inlined_call_operand.vmem [shape: f32[4,1], index: 3, kind: input, shape index: {}]   ;;  %s1351_s4 = inlined_call_operand.vmem [shape: bf16[4,36], index: 4, kind: input, shape index: {}]   ;;  %s1352_s5 = inlined_call_operand.vmem [shape: f32[4,1], index: 5, kind: input, shape index: {}]   ;;  %s1353_s6 = inlined_call_operand.vmem [shape: f32[4,1], index: 6, kind: input, shape index: {}]   ;;  %s1354_s7 = inlined_call_operand.hbm [shape: f32[2,4,256], index: 7, kind: output, shape index: {}]  }
   0x1   :  { %14 = vsyncpa [#allocation5 + $0x1], 0  ;;  %s1044_s24 = smov 0   ;;  %s1046_s25 = smov 0  }
   0x2   :  { %s1048_s26 = smov 0   ;;  %s1050_s27 = smov 0  }
   0x3 LB: > { %s1065_s28 = sadd.s32 4294967295, %s991_s27   ;;  %s859_s29 = sadd.s32 4294967294, %s991_s27   ;;  %s991_s27 = sphi %s1050_s27, %s1368_s27   ;;  %s987_s26 = sphi %s1048_s26, %s1367_s26   ;;  %s983_s25 = sphi %s1046_s25, %s1366_s25   ;;  %s979_s24 = sphi %s1044_s24, %s1365_s24  }
   0x4   : > { %s1069_s30 = sadd.s32 1, %s991_s27   ;;  %s179_s8 = sadd.s32 1, %s987_s26 }
   0x5   : > { %s176_s9 = ssub.s32 %s991_s27, %s1069_s30  ;;  %p189_p0 = scmp.ne.s32.totalorder %s987_s26, %s983_s25 }
   0x6   : > { %p177_p1 = scmp.eq.s32.totalorder %s176_s9, 0  ;;  %p190_p2 = scmp.eq.s32.totalorder %s1065_s28, 1 }
   0x7   : > { %p195_p3 = scmp.ne.s32.totalorder %s983_s25, %s979_s24  ;;  %p196_p4 = scmp.eq.s32.totalorder %s859_s29, 1 }
   0x8   : > { %s1080_s10 = scalar_select %p177_p1, %s987_s26, %s179_s8  }
   0x9   : > { %p1082_p5 = por %p190_p2, %p189_p0  ;;  %p1086_p6 = por %p196_p4, %p195_p3 }
   0xa   : > { %p862_p7 = scmp.ge.s32.totalorder %s991_s27, 1  ;;  %p240_p8 = scmp.lt.s32.totalorder %s991_s27, 3 }
   0xc   : > { %p241_p9 = pnand %p862_p7, %p240_p8 }
   0xd   : > { %p272_p10 = scmp.lt.s32.totalorder (!%p241_p9), %s1065_s28, 1  ;;  %s993_s18 = smov (!%p241_p9), 17   ;;  %v278_v2 = vlaneseq (!%p241_p9)  ;;  %vm316_vm0 = vcmask (!%p241_p9), 138240   ;;  %v1002_v19 = vmov (!%p241_p9), 0   ;;  %v535_v20 = vld [vmem:[%s1349_s2] sm:$0xf] (!%p241_p9) }
   0xe   : > { %244 = sbr.rel (%p241_p9) target bundleno = 1067 (0x42b), region = 48  ;;  %s994_s19 = smov (!%p241_p9), 126   ;;  %526 = vmatprep.mubr.bf16.mxu0 (!%p241_p9), %v1002_v19  ;;  %926 = vset.pattern.permute.xlu0 (!%p241_p9), %v1002_v19  ;;  %v543_v21 = vld [vmem:[%s1350_s3] sm:$0xf] (!%p241_p9)  ;;  %vm374_vm3 = vcmask (!%p241_p9), 916480   ;;  %vm429_vm4 = vcmask (!%p241_p9), 785408  }
   0xf   : > { %v1107_v3 = vand.u32 (!%p241_p9), 127, %v278_v2  ;;  %s995_s20 = smov (!%p241_p9), 112   ;;  %s996_s21 = smov (!%p241_p9), 110   ;;  %927 = vset.pattern.permute.xlu1 (!%p241_p9), %v1002_v19  ;;  %750 = vmatprep.mubr.bf16.mxu1 (!%p241_p9), %v1002_v19  ;;  %vm359_vm5 = vcmask (!%p241_p9), 1031168   ;;  %vm395_vm6 = vcmask (!%p241_p9), 908288   ;;  %vm408_vm9 = vcmask (!%p241_p9), 900096  }
  0x10   : > { %s997_s22 = smov (!%p241_p9), 96   ;;  %s998_s23 = smov (!%p241_p9), 111   ;;  %vm342_vm10 = vcmask (!%p241_p9), 1039360   ;;  %vm457_vm11 = vcmask (!%p241_p9), 769024   ;;  %vm444_vm12 = vcmask (!%p241_p9), 777216   ;;  %vm487_vm13 = vcmask (!%p241_p9), 1041408  }
  0x11   : > { %v285_v4 = vand.u32 (!%p241_p9), 15, %v1107_v3  ;;  %v1111_v5 = vadd.s32 (!%p241_p9), 128, %v1107_v3  ;;  %s999_s29 = smov (!%p241_p9), 94   ;;  %s1000_s8 = smov (!%p241_p9), 127   ;;  %vm483_vm14 = vcmask (!%p241_p9), 293888  }
  0x12   : > { %s1001_s9 = smov (!%p241_p9), 95  }
  0x13   : > { %vm1115_vm1 = vcmp.ne.s32.totalorder (!%p241_p9), %v285_v4, 0  ;;  %v292_v7 = vand.u32 (!%p241_p9), 15, %v1111_v5  ;;  %vm1174_vm7 = vcmp.ne.s32.totalorder (!%p241_p9), %v285_v4, 15 }
  0x15   : > { %s273_s13 = scalar_select %p272_p10, %s1065_s28, 1  ;;  %vm1127_vm2 = vcmp.ne.s32.totalorder %v292_v7, 0  ;;  %vm1180_vm8 = vcmp.ne.s32.totalorder %v292_v7, 15 }
  0x17   : > { %s875_s14 = sshll.u32 %s273_s13, 3 }
  0x18   : > { %s276_s17 = scalar_lea.vmem %s1347_s0, %s875_s14 }
  0x19   : > { %v1097_v0 = vld [vmem:[%s276_s17] sm:$0xff] }
  0x1a   : > { %312 = vrot.lane.b32.xlu0 %v1097_v0, %s993_s18  ;;  %v1103_v1 = vcombine.high %v1097_v0, %v1097_v0 }
  0x1e   : > { %314 = vrot.lane.b32.xlu0 %v1103_v1, %s993_s18 }
  0x8c   : > { %v313_v8 = vpop.permute.xlu0 %312 }
  0x8d   : > { %v321_v9 = vsel %vm316_vm0, 0.0, %v313_v8 }
  0x8e   : > { %353 = vrot.lane.b32.xlu1 %v321_v9, %s994_s19  ;;  %368 = vrot.lane.b32.xlu0 %v321_v9, %s995_s20  ;;  %v327_v10 = vsel %vm1115_vm1, %v321_v9, 0.0  ;;  %v333_v16 = vrot.slane %v321_v9, 4 }
  0x8f   : > { %329 = vst [vmem:[#allocation2] sm:$0xf] %v327_v10 }
  0x90   : > { %v315_v12 = vpop.permute.xlu0 %314 }
  0x91   : > { %v317_v13 = vsel %vm316_vm0, %v313_v8, %v315_v12  ;;  %v322_v15 = vsel %vm316_vm0, %v315_v12, 0.0 }
  0x92   : > { %402 = vrot.lane.b32.xlu1 %v321_v9, %s996_s21  ;;  %423 = vrot.lane.b32.xlu0 %v321_v9, %s997_s22  ;;  %v328_v14 = vsel %vm1127_vm2, %v317_v13, 0.0  ;;  %v335_v17 = vrot.slane %v322_v15, 4  ;;  %v334_v18 = vrot.slane %v317_v13, 4 }
  0x93   : > { %330 = vst [vmem:[#allocation2 + $0x8] sm:$0xf] %v328_v14 }
  0x96   : > { %389 = vrot.lane.b32.xlu1 %v321_v9, %s998_s23  ;;  %357 = vrot.lane.b32.xlu0 %v322_v15, %s994_s19 }
  0x9a   : > { %451 = vrot.lane.b32.xlu1 %v321_v9, %s999_s29  ;;  %336 = vrot.lane.b32.xlu0 %v333_v16, %s1000_s8 }
  0x9e   : > { %406 = vrot.lane.b32.xlu0 %v322_v15, %s996_s21  ;;  %370 = vrot.lane.b32.xlu1 %v317_v13, %s995_s20 }
  0xa2   : > { %425 = vrot.lane.b32.xlu0 %v317_v13, %s997_s22  ;;  %372 = vrot.lane.b32.xlu1 %v322_v15, %s995_s20 }
  0xa6   : > { %391 = vrot.lane.b32.xlu0 %v317_v13, %s998_s23  ;;  %355 = vrot.lane.b32.xlu1 %v317_v13, %s994_s19 }
  0xaa   : > { %438 = vrot.lane.b32.xlu0 %v333_v16, %s1001_s9  ;;  %404 = vrot.lane.b32.xlu1 %v317_v13, %s996_s21 }
  0xae   : > { %340 = vrot.lane.b32.xlu0 %v335_v17, %s1000_s8  ;;  %427 = vrot.lane.b32.xlu1 %v322_v15, %s997_s22 }
  0xb2   : > { %442 = vrot.lane.b32.xlu0 %v335_v17, %s1001_s9  ;;  %393 = vrot.lane.b32.xlu1 %v322_v15, %s998_s23 }
  0xb6   : > { %453 = vrot.lane.b32.xlu0 %v317_v13, %s999_s29  ;;  %338 = vrot.lane.b32.xlu1 %v334_v18, %s1000_s8 }
  0xba   : > { %440 = vrot.lane.b32.xlu1 %v334_v18, %s1001_s9  ;;  %538 = vperm.xlu0 %926, %v535_v20  }
  0xbe   : > { %455 = vrot.lane.b32.xlu1 %v322_v15, %s999_s29 }
  0xc2   : > { %546 = vperm.xlu1 %927, %v543_v21  }
 0x100   : > { %v354_v22 = vpop.permute.xlu1 %353  ;;  %v369_v23 = vpop.permute.xlu0 %368 }
 0x104   : > { %v403_v24 = vpop.permute.xlu1 %402  ;;  %v424_v25 = vpop.permute.xlu0 %423 }
 0x108   : > { %v390_v26 = vpop.permute.xlu1 %389  ;;  %v358_v27 = vpop.permute.xlu0 %357 }
 0x10c   : > { %v452_v28 = vpop.permute.xlu1 %451  ;;  %v337_v29 = vpop.permute.xlu0 %336 }
 0x110   : > { %v371_v30 = vpop.permute.xlu1 %370  ;;  %v407_v31 = vpop.permute.xlu0 %406 }
 0x111   : > { %v375_v32 = vsel %vm374_vm3, %v369_v23, %v371_v30 }
 0x112   : > { %v379_v33 = vsel %vm1115_vm1, %v375_v32, 0.0 }
 0x113   : > { %v383_v34 = vrot.slane %v379_v33, 4 }
 0x114   : > { %v373_v35 = vpop.permute.xlu1 %372  ;;  %v426_v36 = vpop.permute.xlu0 %425 }
 0x115   : > { %387 = vst [vmem:[#allocation2 + $0x10] sm:$0xf0] %v383_v34  ;;  %v376_v37 = vsel %vm374_vm3, %v371_v30, %v373_v35  ;;  %v430_v38 = vsel %vm429_vm4, %v424_v25, %v426_v36  ;;  %v466_v35 = vld [vmem:[%s1348_s1] sm:$0x3] }
 0x116   : > { %v380_v39 = vsel %vm1127_vm2, %v376_v37, 0.0  ;;  %v434_v40 = vsel %vm1115_vm1, %v430_v38, 0.0 }
 0x117   : > { %v384_v41 = vrot.slane %v380_v39, 4  ;;  %436 = vst [vmem:[#allocation2 + $0x30] sm:$0xf] %v434_v40 }
 0x118   : > { %v356_v44 = vpop.permute.xlu1 %355  ;;  %v392_v45 = vpop.permute.xlu0 %391 }
 0x119   : > { %388 = vst [vmem:[#allocation2 + $0x18] sm:$0xf0] %v384_v41  ;;  %v360_v46 = vsel %vm359_vm5, %v354_v22, %v356_v44  ;;  %v361_v47 = vsel %vm359_vm5, %v356_v44, %v358_v27  ;;  %v396_v48 = vsel %vm395_vm6, %v390_v26, %v392_v45 }
 0x11a   : > { %v364_v49 = vsel %vm1174_vm7, %v360_v46, 0.0  ;;  %v365_v50 = vsel %vm1180_vm8, %v361_v47, 0.0  ;;  %400 = vst [vmem:[#allocation2 + $0x20] sm:$0xf] %v396_v48 }
 0x11b   : > { %366 = vst [vmem:[#allocation2 + $0x10] sm:$0xf] %v364_v49  ;;  %367 = vst [vmem:[#allocation2 + $0x18] sm:$0xf] %v365_v50 }
 0x11c   : > { %v405_v51 = vpop.permute.xlu1 %404  ;;  %v439_v52 = vpop.permute.xlu0 %438 }
 0x11d   : > { %v409_v53 = vsel %vm408_vm9, %v403_v24, %v405_v51  ;;  %v410_v54 = vsel %vm408_vm9, %v405_v51, %v407_v31 }
 0x11e   : > { %v413_v55 = vsel %vm1174_vm7, %v409_v53, 0.0  ;;  %v414_v56 = vsel %vm1180_vm8, %v410_v54, 0.0 }
 0x11f   : > { %v417_v57 = vrot.slane %v413_v55, 4  ;;  %v418_v58 = vrot.slane %v414_v56, 4 }
 0x120   : > { %v428_v59 = vpop.permute.xlu1 %427  ;;  %v341_v60 = vpop.permute.xlu0 %340 }
 0x121   : > { %421 = vst [vmem:[#allocation2 + $0x20] sm:$0xf0] %v417_v57  ;;  %422 = vst [vmem:[#allocation2 + $0x28] sm:$0xf0] %v418_v58  ;;  %v431_v61 = vsel %vm429_vm4, %v426_v36, %v428_v59 }
 0x122   : > { %v435_v62 = vsel %vm1127_vm2, %v431_v61, 0.0  ;;  %v470_v16 = vld [vmem:[#allocation2 + $0x18] sm:$0xff]  ;;  %v469_v20 = vld [vmem:[#allocation2 + $0x10] sm:$0xff]  ;;  %v767_v61 = vld [vmem:[%s1353_s6] sm:$0xf] }
 0x123   : > { %437 = vst [vmem:[#allocation2 + $0x38] sm:$0xf] %v435_v62 }
 0x124   : > { %v394_v63 = vpop.permute.xlu1 %393  ;;  %v443_v2 = vpop.permute.xlu0 %442 }
 0x125   : > { %v397_v3 = vsel %vm395_vm6, %v392_v45, %v394_v63 }
 0x126   : > { %401 = vst [vmem:[#allocation2 + $0x28] sm:$0xf] %v397_v3 }
 0x128   : > { %v339_v4 = vpop.permute.xlu1 %338  ;;  %v454_v5 = vpop.permute.xlu0 %453  ;;  %v471_v24 = vld [vmem:[#allocation2 + $0x20] sm:$0xff] }
 0x129   : > { %v343_v7 = vsel %vm342_vm10, %v337_v29, %v339_v4  ;;  %v344_v8 = vsel %vm342_vm10, %v339_v4, %v341_v60  ;;  %v458_v9 = vsel %vm457_vm11, %v452_v28, %v454_v5  ;;  %v759_v60 = vld [vmem:[%s1352_s5] sm:$0xf] }
 0x12a   : > { %347 = vst [vmem:[#allocation2] sm:$0xf0] %v343_v7  ;;  %348 = vst [vmem:[#allocation2 + $0x8] sm:$0xf0] %v344_v8  ;;  %v462_v10 = vsel %vm1174_vm7, %v458_v9, 0.0 }
 0x12b   : > { %464 = vst [vmem:[#allocation2 + $0x40] sm:$0xf] %v462_v10 }
 0x12c   : > { %v441_v12 = vpop.permute.xlu1 %440 }
 0x12d   : > { %v445_v13 = vsel %vm444_vm12, %v439_v52, %v441_v12  ;;  %v446_v14 = vsel %vm444_vm12, %v441_v12, %v443_v2  ;;  %v472_v25 = vld [vmem:[#allocation2 + $0x28] sm:$0xff] }
 0x12e   : > { %449 = vst [vmem:[#allocation2 + $0x30] sm:$0xf0] %v445_v13  ;;  %450 = vst [vmem:[#allocation2 + $0x38] sm:$0xf0] %v446_v14 }
 0x130   : > { %v456_v15 = vpop.permute.xlu1 %455 }
 0x131   : > { %v459_v17 = vsel %vm457_vm11, %v454_v5, %v456_v15  ;;  %v468_v18 = vld [vmem:[#allocation2 + $0x8] sm:$0xff]  ;;  %v467_v19 = vld [vmem:[#allocation2] sm:$0xff] }
 0x132   : > { %v463_v21 = vsel %vm1180_vm8, %v459_v17, 0.0  ;;  %v478_v22 = vpack.c.bf16 %v470_v16, %v468_v18  ;;  %v477_v23 = vpack.c.bf16 %v469_v20, %v467_v19  ;;  %v475_v30 = vld [vmem:[#allocation2 + $0x40] sm:$0xf] }
 0x133   : > { %465 = vst [vmem:[#allocation2 + $0x48] sm:$0xf] %v463_v21  ;;  %v481_v31 = vpack.c.bf16 %v475_v30, %v475_v30 }
 0x134   : > { %494 = vmatprep.subr.bf16.mxu0 %v478_v22 }
 0x135   : > { %495 = vmatpush1.bf16.msra.mxu0 %v477_v23  ;;  %v474_v26 = vld [vmem:[#allocation2 + $0x38] sm:$0xff]  ;;  %v473_v27 = vld [vmem:[#allocation2 + $0x30] sm:$0xff]  ;;  %v489_v34 = vsel %vm487_vm13, %v481_v31, 0 }
 0x136   : > { %v480_v28 = vpack.c.bf16 %v474_v26, %v472_v25  ;;  %v479_v29 = vpack.c.bf16 %v473_v27, %v471_v24 }
 0x138   : > { %496 = vmatprep.subr.bf16.mxu0 %v480_v28 }
 0x139   : > { %497 = vmatpush1.bf16.msra.mxu0 %v479_v29  ;;  %v539_v36 = vpop.permute.xlu0 %538 }
 0x13a   : > { %v476_v32 = vld [vmem:[#allocation2 + $0x48] sm:$0xf] }
 0x13b   : > { %v482_v33 = vpack.c.bf16 %v476_v32, %v476_v32 }
 0x13d   : > { %866 = vmatprep.subr.msk.bf16.mxu0 %vm487_vm13, %v482_v33 }
 0x13e   : > { %499 = vmatpush1.bf16.msra.mxu0 %v489_v34 }
 0x141   : > { %867 = vmatmul.mubr.msk.bf16.vlgmr.msra.gmra.mrb[0].mxu0 %vm483_vm14, %v466_v35  ;;  %v547_v38 = vpop.permute.xlu1 %546 }
 0x214   : > { %v528_v37 = vpop.f32.mrb[0].mxu0 }
 0x215   : > { %v541_v39 = vmul.f32 %v539_v36, %v528_v37  ;;  %v530_v40 = vpop.f32.mrb[1].mxu0 }
 0x216   : > { %v542_v41 = vmul.f32 %v539_v36, %v530_v40  ;;  %v532_v44 = vpop.f32.mrb[2].mxu0 }
 0x217   : > { %v549_v45 = vadd.f32 %v547_v38, %v541_v39  ;;  %v533_v46 = vpop.f32.mrb[3].mxu0 }
 0x218   : > { %v550_v47 = vadd.f32 %v547_v38, %v542_v41 }
 0x219   : > { %v551_v48 = vmax.f32 %v549_v45, 0.0 }
 0x21a   : > { %v552_v49 = vmax.f32 %v550_v47, 0.0 }
 0x21b   : > { %555 = vrot.lane.b32.xlu1 %v551_v48, %s993_s18 }
 0x21c   : > { %557 = vrot.lane.b32.xlu0 %v552_v49, %s993_s18 }
 0x28d   : > { %v556_v50 = vpop.permute.xlu1 %555 }
 0x28e   : > { %v563_v51 = vsel %vm316_vm0, 0.0, %v556_v50  ;;  %v558_v52 = vpop.permute.xlu0 %557 }
 0x28f   : > { %v565_v53 = vsel %vm1115_vm1, %v563_v51, 0.0  ;;  %v559_v54 = vsel %vm316_vm0, %v556_v50, %v558_v52  ;;  %586 = vrot.lane.b32.xlu0 %v563_v51, %s994_s19  ;;  %600 = vrot.lane.b32.xlu1 %v563_v51, %s995_s20  ;;  %v564_v56 = vsel %vm316_vm0, %v558_v52, 0.0  ;;  %v571_v57 = vrot.slane %v563_v51, 4 }
 0x290   : > { %567 = vst [vmem:[#allocation3] sm:$0xf] %v565_v53  ;;  %v566_v55 = vsel %vm1127_vm2, %v559_v54, 0.0  ;;  %v573_v58 = vrot.slane %v564_v56, 4  ;;  %v572_v59 = vrot.slane %v559_v54, 4 }
 0x291   : > { %568 = vst [vmem:[#allocation3 + $0x8] sm:$0xf] %v566_v55 }
 0x293   : > { %632 = vrot.lane.b32.xlu0 %v563_v51, %s996_s21  ;;  %652 = vrot.lane.b32.xlu1 %v563_v51, %s997_s22 }
 0x297   : > { %620 = vrot.lane.b32.xlu0 %v563_v51, %s998_s23  ;;  %602 = vrot.lane.b32.xlu1 %v559_v54, %s995_s20 }
 0x29b   : > { %678 = vrot.lane.b32.xlu0 %v563_v51, %s999_s29  ;;  %590 = vrot.lane.b32.xlu1 %v564_v56, %s994_s19 }
 0x29f   : > { %604 = vrot.lane.b32.xlu0 %v564_v56, %s995_s20  ;;  %636 = vrot.lane.b32.xlu1 %v564_v56, %s996_s21 }
 0x2a3   : > { %588 = vrot.lane.b32.xlu0 %v559_v54, %s994_s19  ;;  %654 = vrot.lane.b32.xlu1 %v559_v54, %s997_s22 }
 0x2a7   : > { %634 = vrot.lane.b32.xlu0 %v559_v54, %s996_s21  ;;  %622 = vrot.lane.b32.xlu1 %v559_v54, %s998_s23 }
 0x2ab   : > { %656 = vrot.lane.b32.xlu0 %v564_v56, %s997_s22  ;;  %574 = vrot.lane.b32.xlu1 %v571_v57, %s1000_s8 }
 0x2af   : > { %624 = vrot.lane.b32.xlu0 %v564_v56, %s998_s23  ;;  %666 = vrot.lane.b32.xlu1 %v571_v57, %s1001_s9 }
 0x2b3   : > { %578 = vrot.lane.b32.xlu1 %v573_v58, %s1000_s8  ;;  %576 = vrot.lane.b32.xlu0 %v572_v59, %s1000_s8 }
 0x2b7   : > { %670 = vrot.lane.b32.xlu1 %v573_v58, %s1001_s9  ;;  %668 = vrot.lane.b32.xlu0 %v572_v59, %s1001_s9  ;;  %s876_s9 = sshll.u32 %s1065_s28, 7  ;;  %s1003_s28 = smov [#allocation4]  }
 0x2b8   : > { %s1305_s13 = scalar_lea.hbm %s1354_s7, %s876_s9  ;;  %s933_s20 = sshll.u32 %s1003_s28, 4  ;;  %s934_s20 = int_to_ptr.vmem [resolvable:$false] %s933_s20 }
 0x2b9   : > { %s935_s21 = scalar_lea.vmem %s934_s20, 256 }
 0x2bb   : > { %680 = vrot.lane.b32.xlu1 %v559_v54, %s999_s29  ;;  %682 = vrot.lane.b32.xlu0 %v564_v56, %s999_s29  ;;  %s269_s29 = sand.u32 1, %s983_s25  }
 0x2bc   : > { %s863_s8 = sshll.u32 %s269_s29, 3  ;;  %s786_s18 = scalar_lea.sflag [#allocation5], %s269_s29 }
 0x2bd   : > { %s271_s14 = scalar_lea.vmem [#allocation4], %s863_s8 }
 0x2be   : > { %s800_s15 = sshll.u32 %s271_s14, 4  ;;  %s1307_s15 = int_to_ptr.vmem [resolvable:$true] %s800_s15 }
 0x2bf   : > { %762 = vperm.xlu1 %927, %v759_v60   ;;  %770 = vperm.xlu0 %926, %v767_v61   ;;  %s929_s19 = scalar_lea.vmem %s1307_s15, 128  ;;  %p936_p0 = scmp.lt.s32.totalorder %s1307_s15, %s934_s20 }
 0x2c0   : > { %p930_p11 = scmp.ne.s32.totalorder %s1307_s15, %s929_s19  ;;  %p937_p1 = scmp.lt.s32.totalorder %s935_s21, %s929_s19 }
 0x2c2   : > { %p931_p12 = pnand %p930_p11, %p1082_p5  ;;  %p938_p2 = por %p937_p1, %p936_p0 }
 0x2c4   : > { %p932_p13 = pneg %p931_p12 }
 0x2c6   : > { %p939_p3 = pnand %p938_p2, %p932_p13 }
 0x301   : > { %v587_v62 = vpop.permute.xlu0 %586  ;;  %v601_v63 = vpop.permute.xlu1 %600 }
 0x305   : > { %v633_v2 = vpop.permute.xlu0 %632  ;;  %v653_v3 = vpop.permute.xlu1 %652 }
 0x309   : > { %v621_v4 = vpop.permute.xlu0 %620  ;;  %v603_v5 = vpop.permute.xlu1 %602 }
 0x30a   : > { %v606_v7 = vsel %vm374_vm3, %v601_v63, %v603_v5 }
 0x30b   : > { %v610_v8 = vsel %vm1115_vm1, %v606_v7, 0.0 }
 0x30c   : > { %v614_v9 = vrot.slane %v610_v8, 4 }
 0x30d   : > { %v679_v10 = vpop.permute.xlu0 %678  ;;  %v591_v12 = vpop.permute.xlu1 %590 }
 0x30e   : > { %618 = vst [vmem:[#allocation3 + $0x10] sm:$0xf0] %v614_v9 }
 0x311   : > { %v605_v13 = vpop.permute.xlu0 %604  ;;  %v637_v14 = vpop.permute.xlu1 %636 }
 0x312   : > { %v607_v15 = vsel %vm374_vm3, %v603_v5, %v605_v13 }
 0x313   : > { %v611_v16 = vsel %vm1127_vm2, %v607_v15, 0.0 }
 0x314   : > { %v615_v17 = vrot.slane %v611_v16, 4 }
 0x315   : > { %v589_v18 = vpop.permute.xlu0 %588  ;;  %v655_v19 = vpop.permute.xlu1 %654 }
 0x316   : > { %619 = vst [vmem:[#allocation3 + $0x18] sm:$0xf0] %v615_v17  ;;  %v592_v20 = vsel %vm359_vm5, %v587_v62, %v589_v18  ;;  %v593_v21 = vsel %vm359_vm5, %v589_v18, %v591_v12  ;;  %v658_v22 = vsel %vm429_vm4, %v653_v3, %v655_v19 }
 0x317   : > { %v596_v23 = vsel %vm1174_vm7, %v592_v20, 0.0  ;;  %v597_v24 = vsel %vm1180_vm8, %v593_v21, 0.0  ;;  %v662_v25 = vsel %vm1115_vm1, %v658_v22, 0.0 }
 0x318   : > { %598 = vst [vmem:[#allocation3 + $0x10] sm:$0xf] %v596_v23  ;;  %599 = vst [vmem:[#allocation3 + $0x18] sm:$0xf] %v597_v24 }
 0x319   : > { %664 = vst [vmem:[#allocation3 + $0x30] sm:$0xf] %v662_v25  ;;  %v635_v26 = vpop.permute.xlu0 %634  ;;  %v623_v27 = vpop.permute.xlu1 %622 }
 0x31a   : > { %v638_v28 = vsel %vm408_vm9, %v633_v2, %v635_v26  ;;  %v639_v29 = vsel %vm408_vm9, %v635_v26, %v637_v14  ;;  %v626_v30 = vsel %vm395_vm6, %v621_v4, %v623_v27 }
 0x31b   : > { %v642_v31 = vsel %vm1174_vm7, %v638_v28, 0.0  ;;  %v643_v32 = vsel %vm1180_vm8, %v639_v29, 0.0  ;;  %630 = vst [vmem:[#allocation3 + $0x20] sm:$0xf] %v626_v30 }
 0x31c   : > { %v646_v6 = vrot.slane %v642_v31, 4  ;;  %v647_v33 = vrot.slane %v643_v32, 4 }
 0x31d   : > { %v657_v34 = vpop.permute.xlu0 %656  ;;  %v575_v35 = vpop.permute.xlu1 %574 }
 0x31e   : > { %650 = vst [vmem:[#allocation3 + $0x20] sm:$0xf0] %v646_v6  ;;  %651 = vst [vmem:[#allocation3 + $0x28] sm:$0xf0] %v647_v33  ;;  %v659_v36 = vsel %vm429_vm4, %v655_v19, %v657_v34 }
 0x31f   : > { %v663_v37 = vsel %vm1127_vm2, %v659_v36, 0.0  ;;  %v696_v52 = vld [vmem:[#allocation3 + $0x18] sm:$0xff]  ;;  %v695_v57 = vld [vmem:[#allocation3 + $0x10] sm:$0xff] }
 0x320   : > { %665 = vst [vmem:[#allocation3 + $0x38] sm:$0xf] %v663_v37 }
 0x321   : > { %v625_v38 = vpop.permute.xlu0 %624  ;;  %v667_v39 = vpop.permute.xlu1 %666 }
 0x322   : > { %v627_v40 = vsel %vm395_vm6, %v623_v27, %v625_v38 }
 0x323   : > { %631 = vst [vmem:[#allocation3 + $0x28] sm:$0xf] %v627_v40 }
 0x325   : > { %v579_v41 = vpop.permute.xlu1 %578  ;;  %v577_v44 = vpop.permute.xlu0 %576  ;;  %v697_v62 = vld [vmem:[#allocation3 + $0x20] sm:$0xff] }
 0x326   : > { %v580_v45 = vsel %vm342_vm10, %v575_v35, %v577_v44  ;;  %v581_v46 = vsel %vm342_vm10, %v577_v44, %v579_v41 }
 0x327   : > { %584 = vst [vmem:[#allocation3] sm:$0xf0] %v580_v45  ;;  %585 = vst [vmem:[#allocation3 + $0x8] sm:$0xf0] %v581_v46 }
 0x329   : > { %v671_v47 = vpop.permute.xlu1 %670  ;;  %v669_v48 = vpop.permute.xlu0 %668 }
 0x32a   : > { %v672_v49 = vsel %vm444_vm12, %v667_v39, %v669_v48  ;;  %v673_v11 = vsel %vm444_vm12, %v669_v48, %v671_v47  ;;  %v698_v63 = vld [vmem:[#allocation3 + $0x28] sm:$0xff] }
 0x32b   : > { %676 = vst [vmem:[#allocation3 + $0x30] sm:$0xf0] %v672_v49  ;;  %677 = vst [vmem:[#allocation3 + $0x38] sm:$0xf0] %v673_v11 }
 0x32d   : > { %v681_v50 = vpop.permute.xlu1 %680  ;;  %v683_v51 = vpop.permute.xlu0 %682 }
 0x32e   : > { %v684_v53 = vsel %vm457_vm11, %v679_v10, %v681_v50  ;;  %v685_v54 = vsel %vm457_vm11, %v681_v50, %v683_v51  ;;  %v694_v55 = vld [vmem:[#allocation3 + $0x8] sm:$0xff]  ;;  %v693_v56 = vld [vmem:[#allocation3] sm:$0xff]  ;;  %v692_v10 = vld [vmem:[%s1351_s4] sm:$0x3] }
 0x32f   : > { %v688_v58 = vsel %vm1174_vm7, %v684_v53, 0.0  ;;  %v689_v59 = vsel %vm1180_vm8, %v685_v54, 0.0  ;;  %v704_v60 = vpack.c.bf16 %v696_v52, %v694_v55  ;;  %v703_v61 = vpack.c.bf16 %v695_v57, %v693_v56 }
 0x330   : > { %690 = vst [vmem:[#allocation3 + $0x40] sm:$0xf] %v688_v58  ;;  %691 = vst [vmem:[#allocation3 + $0x48] sm:$0xf] %v689_v59 }
 0x331   : > { %718 = vmatprep.subr.bf16.mxu1 %v704_v60 }
 0x332   : > { %719 = vmatpush1.bf16.msra.mxu1 %v703_v61  ;;  %v700_v2 = vld [vmem:[#allocation3 + $0x38] sm:$0xff]  ;;  %v699_v3 = vld [vmem:[#allocation3 + $0x30] sm:$0xff] }
 0x333   : > { %v706_v4 = vpack.c.bf16 %v700_v2, %v698_v63  ;;  %v705_v5 = vpack.c.bf16 %v699_v3, %v697_v62 }
 0x335   : > { %720 = vmatprep.subr.bf16.mxu1 %v706_v4 }
 0x336   : > { %721 = vmatpush1.bf16.msra.mxu1 %v705_v5 }
 0x337   : > { %v702_v42 = vld [vmem:[#allocation3 + $0x48] sm:$0xf]  ;;  %v701_v7 = vld [vmem:[#allocation3 + $0x40] sm:$0xf] }
 0x338   : > { %v708_v8 = vpack.c.bf16 %v702_v42, %v702_v42  ;;  %v707_v43 = vpack.c.bf16 %v701_v7, %v701_v7 }
 0x33a   : > { %868 = vmatprep.subr.msk.bf16.mxu1 %vm487_vm13, %v708_v8  ;;  %v713_v9 = vsel %vm487_vm13, %v707_v43, 0 }
 0x33b   : > { %723 = vmatpush1.bf16.msra.mxu1 %v713_v9 }
 0x33e   : > { %869 = vmatmul.mubr.msk.bf16.vlgmr.msra.gmra.mrb[0].mxu1 %vm483_vm14, %v692_v10  ;;  %v763_v12 = vpop.permute.xlu1 %762  ;;  %v771_v16 = vpop.permute.xlu0 %770 }
 0x411   : > { %v752_v13 = vpop.f32.mrb[0].mxu1 }
 0x412   : > { %v765_v14 = vmul.f32 %v763_v12, %v752_v13  ;;  %v754_v15 = vpop.f32.mrb[1].mxu1 }
 0x413   : > { %v766_v17 = vmul.f32 %v763_v12, %v754_v15  ;;  %v756_v18 = vpop.f32.mrb[2].mxu1 }
 0x414   : > { %v773_v19 = vadd.f32 %v771_v16, %v765_v14  ;;  %v757_v20 = vpop.f32.mrb[3].mxu1 }
 0x415   : > { %v774_v21 = vadd.f32 %v771_v16, %v766_v17 }
 0x416   : > { %v776_v22 = vadd.f32 %v773_v19, %v1097_v0 }
 0x417   : > { %v777_v23 = vadd.f32 %v774_v21, %v1103_v1 }
 0x418   : > { %v778_v24 = vmax.f32 %v776_v22, 0.0 }
 0x419   : > { %v779_v25 = vmax.f32 %v777_v23, 0.0 }
 0x41b   : > { %v782_v26 = vcombine.low %v778_v24, %v779_v25 }
 0x41d   : > { %784 = vst [vmem:[%s271_s14] sm:$0xff] %v782_v26 }
 0x41e   : > { %942 = shalt.err (!%p939_p3)
}
 0x41f   : > { %s943_s22 = scalar_lea.hbm %s1305_s13, 128  ;;  %s947_s8 = scalar_lea.hbm %s1354_s7, 256 }
 0x420   : > { %p944_p4 = scmp.ne.s32.totalorder %s1305_s13, %s943_s22  ;;  %p948_p9 = scmp.lt.u32.totalorder %s1305_s13, %s1354_s7 }
 0x421   : > { %p949_p10 = scmp.lt.u32.totalorder %s947_s8, %s943_s22  ;;  %p951_p12 = scmp.lt.u32.totalorder %s943_s22, %s1305_s13 }
 0x422   : > { %p945_p7 = pnand %p944_p4, %p1082_p5 }
 0x423   : > { %p950_p11 = por %p949_p10, %p948_p9 }
 0x424   : > { %p946_p8 = pneg %p945_p7 }
 0x425   : > { %p952_p13 = por %p951_p12, %p950_p11 }
 0x427   : > { %p953_p0 = pnand %p952_p13, %p946_p8 }
 0x429   : > { %956 = shalt.err (!%p953_p0)
}
 0x42a   : > { %877 = dma.vmem_to_hbm [thread:$0]  (%p1082_p5), %s1307_s15, 128, %s1305_s13, %s786_s18  }
 0x42b PF: > { %p883_p1 = scmp.ge.s32.totalorder %s991_s27, 2  ;;  %s812_s16 = sand.u32 1, %s979_s24  }
 0x42c   : > { %s813_s17 = scalar_lea.sflag [#allocation5], %s812_s16 }
 0x42d   : > { %p880_p2 = pnand %p883_p1, %p1086_p6 }
 0x42f   : > { %974 = dma.done.wait (!%p880_p2), %s813_s17, 128  }
 0x430   : > { %976 = vsyncadd (!%p880_p2), %s813_s17, 4294967168  ;;  %p17_p3 = scmp.ge.s32.totalorder %s1069_s30, 4   ;;  %s1365_s24 = smov %s983_s25 }
 0x431   : > { %s1366_s25 = smov %s987_s26  ;;  %s1367_s26 = smov %s1080_s10 }
 0x432   : > { %s1368_s27 = smov %s1069_s30  ;;  %19 = sbr.rel (!%p17_p3) target bundleno = 3 (0x3), region = 83 }
 0x439   :  { %818 = vsyncpa [#allocation5], 1 }
 0x43a   :  { %820 = vsyncpa [#allocation5 + $0x1], 1 }

</bundles_post_ra>
